<compile_context>
chip_gen: v6e
topology: v6e:2x2x1
jax: 0.10.0
libtpu: 0.0.40
codegen_flags: <defaults>
</compile_context>

<pallas_src>
import jax
import jax.numpy as jnp
from jax.experimental import pallas as pl
from jax.experimental.pallas import tpu as pltpu


def _round_up(x, m):
    return (x + m - 1) // m * m


def _conv2d_gemm_kernel(w_ref, p_ref, o_ref):
    """One MXU matmul per M-tile; bias is folded into the GEMM via a ones row.

    w_ref: (COUT_pad, K_pad)  f32   -- im2col'ed weights, bias in column K
    p_ref: (K_pad,   TM)      f32   -- im2col'ed input patches, row K == 1.0
    o_ref: (COUT_pad, TM)     f32   -- lane-dense output tile
    """
    o_ref[...] = jnp.dot(w_ref[...], p_ref[...], preferred_element_type=jnp.float32)


def conv2d_pallas(x_nchw, weight_oihw, bias, *, tm=256):
    """Valid (padding=0), stride=1 2-D convolution matching torch.nn.Conv2d."""
    N, CIN, H, W = x_nchw.shape
    COUT, CIN_w, KH, KW = weight_oihw.shape
    assert CIN == CIN_w
    OH = H - KH + 1
    OW = W - KW + 1

    K = CIN * KH * KW                 # contraction size (27)
    M = N * OH * OW                   # number of output pixels (392)
    K_pad = _round_up(K + 1, 8)       # sublane-aligned contraction; +1 row for the bias
    M_pad = _round_up(M, 128)         # lane-dense output / rhs columns
    COUT_pad = _round_up(COUT, 8)     # sublane-aligned output rows

    tm = min(tm, M_pad)
    assert tm % 128 == 0 and M_pad % tm == 0

    x = x_nchw.astype(jnp.float32)

    # ---- im2col in one fused XLA op (layout plumbing, not compute hoisting) ----
    # Output channels are ordered (ci, kh, kw)-major, matching weight.reshape(COUT, K).
    patches = jax.lax.conv_general_dilated_patches(
        x, filter_shape=(KH, KW), window_strides=(1, 1), padding="VALID",
        dimension_numbers=("NCHW", "OIHW", "NCHW"))          # (N, K, OH, OW)
    # M axis ordered (n, oh, ow) so the output reshapes cleanly back to NCHW.
    patches = patches.transpose(1, 0, 2, 3).reshape(K, M)     # (K, M)
    patches = jnp.pad(patches, ((0, K_pad - K), (0, M_pad - M)))
    patches = patches.at[K, :].set(1.0)                        # ones row -> bias via MXU

    w2 = weight_oihw.reshape(COUT, K).astype(jnp.float32)
    w2 = jnp.pad(w2, ((0, COUT_pad - COUT), (0, K_pad - K)))   # (COUT_pad, K_pad)
    w2 = w2.at[:COUT, K].set(bias.astype(jnp.float32))          # bias column

    grid = (M_pad // tm,)
    out_pad = pl.pallas_call(
        _conv2d_gemm_kernel,
        out_shape=jax.ShapeDtypeStruct((COUT_pad, M_pad), jnp.float32),
        grid=grid,
        in_specs=[
            # Weights: tiny, resident for every grid step.
            pl.BlockSpec((COUT_pad, K_pad), lambda i: (0, 0)),
            # Patches: one lane-dense M-tile per step (double-buffered by BlockSpec).
            pl.BlockSpec((K_pad, tm), lambda i: (0, i)),
        ],
        out_specs=pl.BlockSpec((COUT_pad, tm), lambda i: (0, i)),
        compiler_params=pltpu.CompilerParams(
            dimension_semantics=("parallel",)),
    )(w2, patches)

    # Undo the padding / lane-dense layout back to NCHW.
    out = out_pad[:COUT, :M].reshape(COUT, N, OH, OW).transpose(1, 0, 2, 3)
    return out


if __name__ == "__main__":
    # Imgnn: Conv2d(in_channels=3, out_channels=6, kernel_size=3, stride=1, padding=0)
    N, CIN, H, W = 2, 3, 16, 16
    COUT, KH, KW = 6, 3, 3
    OH, OW = H - KH + 1, W - KW + 1

    key = jax.random.PRNGKey(0)
    kx, kw_, kb = jax.random.split(key, 3)

    x = jax.random.normal(kx, (N, CIN, H, W), dtype=jnp.float32)

    # Deterministic parameter init mimicking PyTorch's default uniform bound 1/sqrt(fan_in).
    fan_in = CIN * KH * KW
    bound = 1.0 / (fan_in ** 0.5)
    weight = jax.random.uniform(
        kw_, (COUT, CIN, KH, KW), dtype=jnp.float32, minval=-bound, maxval=bound)
    bias = jax.random.uniform(
        kb, (COUT,), dtype=jnp.float32, minval=-bound, maxval=bound)

    conv = jax.jit(conv2d_pallas)
    out = jax.block_until_ready(conv(x, weight, bias))

    # Reference check against XLA's conv (NCHW / OIHW, VALID padding, stride 1).
    ref = jax.lax.conv_general_dilated(
        x, weight, window_strides=(1, 1), padding="VALID",
        dimension_numbers=("NCHW", "OIHW", "NCHW"),
    ) + bias.reshape(1, COUT, 1, 1)

    assert out.shape == (N, COUT, OH, OW), out.shape
    assert jnp.allclose(out, ref, rtol=1e-4, atol=1e-4), float(jnp.max(jnp.abs(out - ref)))

    print("KERNEL_OK")
</pallas_src>

<mosaic_0001>
module attributes {stable_mosaic.version = 11 : i64} {
  func.func @_conv2d_gemm_kernel(%arg0: i32, %arg1: memref<8x32xf32, #tpu.memory_space<vmem>>, %arg2: memref<32x256xf32, #tpu.memory_space<vmem>>, %arg3: memref<8x256xf32, #tpu.memory_space<vmem>>) attributes {dimension_semantics = [#tpu.dimension_semantics<parallel>], iteration_bounds = array<i64: 2>, scalar_prefetch = 0 : i64, scratch_operands = 0 : i64, tpu.core_type = #tpu.core_type<tc>, window_params = [{pipeline_mode = #tpu.pipeline_mode<synchronous>, transform_indices = @transform_0, window_bounds = array<i64: 8, 32>}, {transform_indices = @transform_1, window_bounds = array<i64: 32, 256>}, {transform_indices = @transform_2, window_bounds = array<i64: 8, 256>}]} {
    %c0 = arith.constant 0 : index
    %c0_0 = arith.constant 0 : index
    %0 = vector.load %arg1[%c0, %c0_0] : memref<8x32xf32, #tpu.memory_space<vmem>>, vector<8x32xf32>
    %c0_1 = arith.constant 0 : index
    %c0_2 = arith.constant 0 : index
    %1 = vector.load %arg2[%c0_1, %c0_2] : memref<32x256xf32, #tpu.memory_space<vmem>>, vector<32x256xf32>
    %cst = arith.constant dense<0.000000e+00> : vector<8x256xf32>
    %2 = tpu.matmul %0, %1, %cst {dimension_numbers = #tpu.dot_dimension_numbers<[1], [0], [0], [1], [0, 0, 1, 1], [], []>} : vector<8x32xf32>, vector<32x256xf32>, vector<8x256xf32> -> vector<8x256xf32>
    %c0_3 = arith.constant 0 : index
    %c0_4 = arith.constant 0 : index
    %3 = vector.load %arg3[%c0_3, %c0_4] : memref<8x256xf32, #tpu.memory_space<vmem>>, vector<8x256xf32>
    tpu.vector_store %arg3[%c0_3, %c0_4], %2 {strides = array<i32>} : memref<8x256xf32, #tpu.memory_space<vmem>>, vector<8x256xf32>,
    return
  }
  func.func @transform_0(%arg0: i32) -> (i32, i32) {
    %c0_i32 = arith.constant 0 : i32
    %c0_i32_0 = arith.constant 0 : i32
    %c0_i32_1 = arith.constant 0 : i32
    return %c0_i32, %c0_i32_0 : i32, i32
  }
  func.func @transform_1(%arg0: i32) -> (i32, i32) {
    %c0_i32 = arith.constant 0 : i32
    %c0_i32_0 = arith.constant 0 : i32
    return %c0_i32, %arg0 : i32, i32
  }
  func.func @transform_2(%arg0: i32) -> (i32, i32) {
    %c0_i32 = arith.constant 0 : i32
    %c0_i32_0 = arith.constant 0 : i32
    return %c0_i32, %arg0 : i32, i32
  }
}

</mosaic_0001>

<bundles_post_ra>
// kernel: conv2d_pallas.1
= control target key start
LH: loop header
LB: loop body
LE: loop exit
PB: predicated region body
PF: predicated region fallthrough
CT: control target
= control target key end

     0   :  { %s408_s9 = smov 0   ;;  %s410_s10 = smov 0   ;;  %s463_s0 = inlined_call_operand.vmem [shape: f32[8,32], index: 0, kind: input, shape index: {}]   ;;  %s464_s1 = inlined_call_operand.vmem [shape: f32[32,512], index: 1, kind: input, shape index: {}]   ;;  %s465_s2 = inlined_call_operand.vmem [shape: f32[8,512], index: 2, kind: output, shape index: {}]  }
   0x1   :  { %s412_s11 = smov 0  }
   0x2 LB: > { %s328_s12 = sadd.s32 4294967295, %s390_s11   ;;  %s425_s13 = sadd.s32 1, %s390_s11   ;;  %s390_s11 = sphi %s412_s11, %s468_s11   ;;  %s386_s10 = sphi %s410_s10, %s467_s10   ;;  %s382_s9 = sphi %s408_s9, %s466_s9  }
   0x3   : > { %s37_s14 = ssub.s32 %s390_s11, %s425_s13  ;;  %s40_s15 = sadd.s32 1, %s386_s10 }
   0x4   : > { %p38_p0 = scmp.eq.s32.totalorder %s37_s14, 0  ;;  %p47_p1 = scmp.ne.s32.totalorder %s386_s10, %s382_s9 }
   0x5   : > { %p48_p2 = scmp.eq.s32.totalorder %s390_s11, 0  ;;  %p331_p4 = scmp.ge.s32.totalorder %s390_s11, 2 }
   0x6   : > { %s434_s16 = scalar_select %p38_p0, %s386_s10, %s40_s15  }
   0x7   : > { %p49_p3 = por %p48_p2, %p47_p1  ;;  %102 = sbr.rel (%p331_p4) target bundleno = 20 (0x14), region = 20 }
   0xc   : > { %105 = sbr.rel (!%p49_p3) target bundleno = 20 (0x14), region = 24  ;;  %s107_s17 = sand.u32 (%p49_p3), 1, %s386_s10  }
   0xd   : > { %s342_s18 = sshll.u32 (%p49_p3), %s390_s11, 4  ;;  %s332_s19 = sshll.u32 (%p49_p3), %s107_s17, 6 }
   0xe   : > { %s112_s22 = scalar_lea.vmem (%p49_p3), %s464_s1, %s342_s18  ;;  %s109_s23 = scalar_lea.vmem (%p49_p3), [#allocation2], %s332_s19 }
   0xf   : > { %v125_v0 = vld [vmem:[%s112_s22] sm:$0xff] (%p49_p3)  ;;  %v127_v1 = vld [vmem:[%s112_s22 + $0x8] sm:$0xff] (%p49_p3) }
  0x10   : > { %v129_v2 = vld [vmem:[%s112_s22 + $0x20] sm:$0xff] (%p49_p3)  ;;  %126 = vst [vmem:[%s109_s23] sm:$0xff] (%p49_p3), %v125_v0  ;;  %128 = vst [vmem:[%s109_s23 + $0x8] sm:$0xff] (%p49_p3), %v127_v1  ;;  %v131_v3 = vld [vmem:[%s112_s22 + $0x28] sm:$0xff] (%p49_p3) }
  0x11   : > { %130 = vst [vmem:[%s109_s23 + $0x10] sm:$0xff] %v129_v2  ;;  %v133_v4 = vld [vmem:[%s112_s22 + $0x40] sm:$0xff]  ;;  %v135_v5 = vld [vmem:[%s112_s22 + $0x48] sm:$0xff]  ;;  %132 = vst [vmem:[%s109_s23 + $0x18] sm:$0xff] %v131_v3 }
  0x12   : > { %134 = vst [vmem:[%s109_s23 + $0x20] sm:$0xff] %v133_v4  ;;  %136 = vst [vmem:[%s109_s23 + $0x28] sm:$0xff] %v135_v5  ;;  %v137_v6 = vld [vmem:[%s112_s22 + $0x60] sm:$0xff]  ;;  %v139_v7 = vld [vmem:[%s112_s22 + $0x68] sm:$0xff] }
  0x13   : > { %138 = vst [vmem:[%s109_s23 + $0x30] sm:$0xff] %v137_v6  ;;  %140 = vst [vmem:[%s109_s23 + $0x38] sm:$0xff] %v139_v7 }
  0x14 PF: > { %p335_p5 = scmp.ge.s32.totalorder %s390_s11, 1  ;;  %p145_p6 = scmp.lt.s32.totalorder %s390_s11, 3 }
  0x16   : > { %p146_p7 = pnand %p335_p5, %p145_p6 }
  0x17   : > { %s152_s24 = sand.u32 (!%p146_p7), 1, %s382_s9   ;;  %s337_s29 = sshll.u32 (!%p146_p7), %s328_s12, 1 }
  0x18   : > { %149 = sbr.rel (%p146_p7) target bundleno = 234 (0xea), region = 47  ;;  %s336_s25 = sshll.u32 (!%p146_p7), %s152_s24, 6 }
  0x19   : > { %s154_s26 = scalar_lea.vmem (!%p146_p7), [#allocation2], %s336_s25  ;;  %p175_p8 = scmp.lt.s32.totalorder (!%p146_p7), %s337_s29, 3 }
  0x1d   : > { %v392_v8 = vmov 0.0   ;;  %v188_v9 = vld [vmem:[%s154_s26 + $0x38] sm:$0xff]  ;;  %v187_v10 = vld [vmem:[%s154_s26 + $0x30] sm:$0xff]  ;;  %v186_v11 = vld [vmem:[%s154_s26 + $0x28] sm:$0xff]  ;;  %vm189_vm0 = vcmask 261120   ;;  %s470_s29 = smov (!%p175_p8, %s337_s29), 3 }
  0x1e   : > { %257 = vmatprep.mubr.f32.mxu0 %v392_v8  ;;  %217 = vmatprep.subr.mxu0 %v188_v9  ;;  %v185_v12 = vld [vmem:[%s154_s26 + $0x20] sm:$0xff]  ;;  %v184_v13 = vld [vmem:[%s154_s26 + $0x18] sm:$0xff]  ;;  %v183_v14 = vld [vmem:[%s154_s26 + $0x10] sm:$0xff]  ;;  %s338_s30 = sshll.u32 %s470_s29, 3 }
  0x1f   : > { %218 = vmatpush1.msra.mxu0 %v187_v10  ;;  %v182_v15 = vld [vmem:[%s154_s26 + $0x8] sm:$0xff]  ;;  %v181_v16 = vld [vmem:[%s154_s26] sm:$0xff]  ;;  %s178_s5 = scalar_lea.vmem %s465_s2, %s338_s30 }
  0x20   : > { %219 = vmatprep.subr.mxu0 %v186_v11  ;;  %v180_v17 = vld [vmem:[%s463_s0] sm:$0xff] }
  0x21   : > { %220 = vmatpush1.msra.mxu0 %v185_v12 }
  0x22   : > { %221 = vmatprep.subr.mxu0 %v184_v13 }
  0x23   : > { %222 = vmatpush1.msra.mxu0 %v183_v14 }
  0x24   : > { %223 = vmatprep.subr.mxu0 %v182_v15 }
  0x25   : > { %224 = vmatpush1.msra.mxu0 %v181_v16 }
  0x26   : > { %339 = vmatmul.mubr.msk.f32.vlgmr.msra.gmra.mxu0 %vm189_vm0, %v180_v17 }
  0xe6   : > { %v259_v18 = vpop.f32.mrf.mxu0 }
  0xe7   : > { %264 = vst [vmem:[%s178_s5] sm:$0xff] %v259_v18 }
  0xe8   : > { %v261_v19 = vpop.f32.mrf.mxu0 }
  0xe9   : > { %265 = vst [vmem:[%s178_s5 + $0x8] sm:$0xff] %v261_v19 }
  0xea PF: > { %p9_p9 = scmp.ge.s32.totalorder %s425_s13, 4   ;;  %s466_s9 = smov %s386_s10 }
  0xeb   : > { %s467_s10 = smov %s434_s16  ;;  %s468_s11 = smov %s425_s13 }
  0xec   :  { %11 = sbr.rel (!%p9_p9) target bundleno = 2 (0x2), region = 86 }

</bundles_post_ra>
